<compile_context>
chip_gen: v5e
topology: v5e:2x2
jax: 0.10.0
libtpu: 0.0.40
codegen_flags: <defaults>
</compile_context>

<pallas_src>
import functools

import jax
import jax.numpy as jnp
from jax.experimental import pallas as pl
from jax.experimental.pallas import tpu as pltpu

HIDDEN_DIM = 128
_LANE = 128
_SUBLANE = 8


def _round_up(x, m):
    return ((x + m - 1) // m) * m


def _mlp_kernel(z_ref, w1_ref, b1_ref, w2_ref, b2_ref, w3_ref, b3_ref,
                sp_ref, raw_ref, h2_ref):
    """Grid = (batch tiles i, output-column tiles j); j is innermost.

    On j == 0 the two hidden layers are computed for this batch tile into the
    persistent VMEM scratch h2_ref; every j-step then runs only the third
    matmul against a (HIDDEN_DIM, tile_n) slice of w3 and the post-activation.
    """
    @pl.when(pl.program_id(1) == 0)
    def _():
        z = z_ref[...]
        h1 = jnp.dot(z, w1_ref[...], preferred_element_type=jnp.float32)
        h1 = jnp.maximum(h1 + b1_ref[...], 0.0)               # f32 elementwise
        h2 = jnp.dot(h1.astype(w2_ref.dtype), w2_ref[...],
                     preferred_element_type=jnp.float32)
        h2_ref[...] = jnp.maximum(h2 + b2_ref[...], 0.0)

    p = jnp.dot(h2_ref[...].astype(w3_ref.dtype), w3_ref[...],
                preferred_element_type=jnp.float32) + b3_ref[...]

    raw_ref[...] = p
    # softplus matching torch.nn.functional.softplus (threshold=20): x for x>20;
    # exp arg is clamped so the not-taken branch cannot overflow.  Kept in f32.
    sp_ref[...] = jnp.where(p > 20.0, p,
                            jnp.log1p(jnp.exp(jnp.minimum(p, 20.0)))) + 1e-07


def joint_node_decoder_forward(z, scale, params, *, protein_dim, gene_dim,
                               block_m=128, tile_n=512, weight_dtype=None):
    """Returns ((normal_loc, normal_scale), (nb_total_count, nb_logits))."""
    w1, b1, w2, b2, w3, b3 = params
    n, z_dim = z.shape
    f32 = jnp.float32
    wdt = f32 if weight_dtype is None else jnp.dtype(weight_dtype)
    itemsize_w = jnp.dtype(wdt).itemsize

    # Only the first protein_dim + gene_dim columns of the 3rd Linear are ever
    # consumed by the module forward; skip the unused tail entirely.
    used_dim = protein_dim + gene_dim

    # ---- padded, lane-dense tiling geometry --------------------------------
    bm = max(_SUBLANE, min(block_m, _round_up(n, _SUBLANE)))
    n_pad = _round_up(n, bm)
    k_pad = _round_up(z_dim, _LANE)
    tn = min(tile_n, _round_up(used_dim, _LANE))
    m_out = _round_up(used_dim, tn)

    # ---- zero-pad operands in the wrapper ----------------------------------
    def pad2(a, rows, cols):
        a = a.astype(f32)
        return jnp.pad(a, ((0, rows - a.shape[0]), (0, cols - a.shape[1])))

    z_p = pad2(z, n_pad, k_pad).astype(wdt)
    w1_p = pad2(w1, k_pad, HIDDEN_DIM).astype(wdt)
    w2_p = w2.astype(wdt)
    w3_p = pad2(w3[:, :used_dim], HIDDEN_DIM, m_out).astype(wdt)
    b1_p = jnp.reshape(b1, (1, -1)).astype(f32)
    b2_p = jnp.reshape(b2, (1, -1)).astype(f32)
    b3_p = pad2(jnp.reshape(b3, (1, -1))[:, :used_dim], 1, m_out)

    grid = (n_pad // bm, m_out // tn)

    # ---- VMEM budget (double-buffered inputs/outputs + scratch) ------------
    vmem_bytes = 2 * (
        bm * k_pad * itemsize_w                       # z tile
        + k_pad * HIDDEN_DIM * itemsize_w             # w1
        + HIDDEN_DIM * HIDDEN_DIM * itemsize_w        # w2
        + 2 * HIDDEN_DIM * 4                          # b1, b2
        + HIDDEN_DIM * tn * itemsize_w                # w3 tile
        + tn * 4                                      # b3 tile
        + 2 * bm * tn * 4                             # sp + raw tiles
    ) + bm * HIDDEN_DIM * 4                           # h2 scratch
    vmem_limit = int(min(max(2 * vmem_bytes, 32 * 2**20), 64 * 2**20))

    flops = 2 * n_pad * (k_pad * HIDDEN_DIM
                         + HIDDEN_DIM * HIDDEN_DIM
                         + HIDDEN_DIM * m_out)
    bytes_accessed = (z_p.size * itemsize_w
                      + (w1_p.size + w2_p.size + w3_p.size) * itemsize_w
                      + (b1_p.size + b2_p.size + b3_p.size) * 4
                      + 2 * n_pad * m_out * 4)
    cost = pl.CostEstimate(flops=int(flops),
                           transcendentals=int(2 * n_pad * m_out),
                           bytes_accessed=int(bytes_accessed))

    sp, raw = pl.pallas_call(
        _mlp_kernel,
        out_shape=(
            jax.ShapeDtypeStruct((n_pad, m_out), jnp.float32),
            jax.ShapeDtypeStruct((n_pad, m_out), jnp.float32),
        ),
        grid_spec=pltpu.PrefetchScalarGridSpec(
            num_scalar_prefetch=0,
            grid=grid,
            in_specs=[
                pl.BlockSpec((bm, k_pad), lambda i, j: (i, 0)),
                pl.BlockSpec((k_pad, HIDDEN_DIM), lambda i, j: (0, 0)),
                pl.BlockSpec((1, HIDDEN_DIM), lambda i, j: (0, 0)),
                pl.BlockSpec((HIDDEN_DIM, HIDDEN_DIM), lambda i, j: (0, 0)),
                pl.BlockSpec((1, HIDDEN_DIM), lambda i, j: (0, 0)),
                pl.BlockSpec((HIDDEN_DIM, tn), lambda i, j: (0, j)),
                pl.BlockSpec((1, tn), lambda i, j: (0, j)),
            ],
            out_specs=[
                pl.BlockSpec((bm, tn), lambda i, j: (i, j)),
                pl.BlockSpec((bm, tn), lambda i, j: (i, j)),
            ],
            scratch_shapes=[pltpu.VMEM((bm, HIDDEN_DIM), jnp.float32)],
        ),
        compiler_params=pltpu.CompilerParams(
            dimension_semantics=("parallel", "arbitrary"),
            vmem_limit_bytes=vmem_limit),
        cost_estimate=cost,
    )(z_p, w1_p, b1_p, w2_p, b2_p, w3_p, b3_p)

    sp = sp[:n, :used_dim]
    raw = raw[:n, :used_dim]

    loc = sp[:, :protein_dim]                    # softplus(x) + 1e-7
    total_count = sp[:, protein_dim:used_dim]    # softplus(r) + 1e-7
    logits = raw[:, protein_dim:used_dim]        # raw log_p slice

    # TODO(synk): torch.distributions Independent(Normal)/NegativeBinomial
    # objects have no Pallas equivalent; we return their parameters instead.
    return (loc, scale), (total_count, logits)


def init_params(key, z_dim, protein_dim, gene_dim):
    out_dim = protein_dim + 2 * gene_dim
    dims = [(z_dim, HIDDEN_DIM), (HIDDEN_DIM, HIDDEN_DIM), (HIDDEN_DIM, out_dim)]
    params = []
    for i, (din, dout) in enumerate(dims):
        kw, kb = jax.random.split(jax.random.fold_in(key, i))
        bound = 1.0 / jnp.sqrt(jnp.float32(din))  # PyTorch Linear default init
        w = jax.random.uniform(kw, (din, dout), jnp.float32, -bound, bound)
        b = jax.random.uniform(kb, (1, dout), jnp.float32, -bound, bound)
        params += [w, b]
    return tuple(params)


def _reference(z, params, protein_dim, gene_dim):
    w1, b1, w2, b2, w3, b3 = params
    h = jnp.maximum(z @ w1 + b1, 0.0)
    h = jnp.maximum(h @ w2 + b2, 0.0)
    p = h @ w3 + b3
    used = protein_dim + gene_dim
    loc = jax.nn.softplus(p[:, :protein_dim]) + 1e-07
    tc = jax.nn.softplus(p[:, protein_dim:used]) + 1e-07
    lg = p[:, protein_dim:used]
    return loc, tc, lg


if __name__ == "__main__":
    key = jax.random.PRNGKey(0)

    # ---- config 1: small demo shapes, single tile --------------------------
    z_dim, protein_dim, gene_dim, batch = 32, 16, 24, 16
    kz, ks, kp = jax.random.split(key, 3)
    z = jax.random.normal(kz, (batch, z_dim), jnp.float32)
    scale = jax.nn.softplus(
        jax.random.normal(ks, (batch, protein_dim), jnp.float32)) + 1e-3
    params = init_params(kp, z_dim, protein_dim, gene_dim)

    fwd = jax.jit(functools.partial(joint_node_decoder_forward,
                                    protein_dim=protein_dim,
                                    gene_dim=gene_dim))
    (loc, sc), (total_count, logits) = fwd(z, scale, params)
    jax.block_until_ready((loc, sc, total_count, logits))

    loc_ref, tc_ref, lg_ref = _reference(z, params, protein_dim, gene_dim)
    assert jnp.allclose(loc, loc_ref, atol=1e-5)
    assert jnp.allclose(total_count, tc_ref, atol=1e-5)
    assert jnp.allclose(logits, lg_ref, atol=1e-5)
    assert jnp.allclose(sc, scale)

    # ---- config 1b: bf16 weight/activation streaming (loose tolerance) -----
    fwd_bf16 = jax.jit(functools.partial(joint_node_decoder_forward,
                                         protein_dim=protein_dim,
                                         gene_dim=gene_dim,
                                         weight_dtype=jnp.bfloat16))
    (loc_b, _), (tc_b, lg_b) = fwd_bf16(z, scale, params)
    jax.block_until_ready((loc_b, tc_b, lg_b))
    assert jnp.max(jnp.abs(lg_b - lg_ref)) < 0.1
    assert jnp.max(jnp.abs(loc_b - loc_ref)) < 0.1

    # ---- config 2: exercises batch tiling, N-tiling and padding ------------
    z_dim2, protein_dim2, gene_dim2, batch2 = 20, 100, 90, 40
    kz2, ks2, kp2 = jax.random.split(jax.random.fold_in(key, 7), 3)
    z2 = jax.random.normal(kz2, (batch2, z_dim2), jnp.float32)
    scale2 = jax.nn.softplus(
        jax.random.normal(ks2, (batch2, protein_dim2), jnp.float32)) + 1e-3
    params2 = init_params(kp2, z_dim2, protein_dim2, gene_dim2)

    fwd2 = jax.jit(functools.partial(joint_node_decoder_forward,
                                     protein_dim=protein_dim2,
                                     gene_dim=gene_dim2,
                                     block_m=16, tile_n=128))
    (loc2, sc2), (tc2, lg2) = fwd2(z2, scale2, params2)
    jax.block_until_ready((loc2, sc2, tc2, lg2))

    loc2_ref, tc2_ref, lg2_ref = _reference(z2, params2, protein_dim2, gene_dim2)
    assert jnp.allclose(loc2, loc2_ref, atol=1e-5)
    assert jnp.allclose(tc2, tc2_ref, atol=1e-5)
    assert jnp.allclose(lg2, lg2_ref, atol=1e-5)

    print("KERNEL_OK")
</pallas_src>

<mosaic_0001>
module attributes {stable_mosaic.version = 11 : i64} {
  func.func @_mlp_kernel(%arg0: i32, %arg1: i32, %arg2: memref<16x128xf32, #tpu.memory_space<vmem>>, %arg3: memref<128x128xf32, #tpu.memory_space<vmem>>, %arg4: memref<1x128xf32, #tpu.memory_space<vmem>>, %arg5: memref<128x128xf32, #tpu.memory_space<vmem>>, %arg6: memref<1x128xf32, #tpu.memory_space<vmem>>, %arg7: memref<128x128xf32, #tpu.memory_space<vmem>>, %arg8: memref<1x128xf32, #tpu.memory_space<vmem>>, %arg9: memref<16x128xf32, #tpu.memory_space<vmem>>, %arg10: memref<16x128xf32, #tpu.memory_space<vmem>>, %arg11: memref<16x128xf32, #tpu.memory_space<vmem>>) attributes {dimension_semantics = [#tpu.dimension_semantics<parallel>, #tpu.dimension_semantics<arbitrary>], iteration_bounds = array<i64: 1, 1>, scalar_prefetch = 0 : i64, scratch_operands = 1 : i64, tpu.core_type = #tpu.core_type<tc>, window_params = [{transform_indices = @transform_0, window_bounds = array<i64: 16, 128>}, {pipeline_mode = #tpu.pipeline_mode<synchronous>, transform_indices = @transform_1, window_bounds = array<i64: 128, 128>}, {pipeline_mode = #tpu.pipeline_mode<synchronous>, transform_indices = @transform_2, window_bounds = array<i64: 1, 128>}, {pipeline_mode = #tpu.pipeline_mode<synchronous>, transform_indices = @transform_3, window_bounds = array<i64: 128, 128>}, {pipeline_mode = #tpu.pipeline_mode<synchronous>, transform_indices = @transform_4, window_bounds = array<i64: 1, 128>}, {transform_indices = @transform_5, window_bounds = array<i64: 128, 128>}, {transform_indices = @transform_6, window_bounds = array<i64: 1, 128>}, {transform_indices = @transform_7, window_bounds = array<i64: 16, 128>}, {transform_indices = @transform_8, window_bounds = array<i64: 16, 128>}]} {
    %c0_i32 = arith.constant 0 : i32
    %0 = arith.cmpi eq, %arg1, %c0_i32 : i32
    %1 = arith.extui %0 : i1 to i32
    %c0_i32_0 = arith.constant 0 : i32
    %2 = arith.cmpi ne, %1, %c0_i32_0 : i32
    scf.if %2 {
      %c0_13 = arith.constant 0 : index
      %c0_14 = arith.constant 0 : index
      %20 = vector.load %arg2[%c0_13, %c0_14] : memref<16x128xf32, #tpu.memory_space<vmem>>, vector<16x128xf32>
      %c0_15 = arith.constant 0 : index
      %c0_16 = arith.constant 0 : index
      %21 = vector.load %arg3[%c0_15, %c0_16] : memref<128x128xf32, #tpu.memory_space<vmem>>, vector<128x128xf32>
      %cst_17 = arith.constant dense<0.000000e+00> : vector<16x128xf32>
      %22 = tpu.matmul %20, %21, %cst_17 {dimension_numbers = #tpu.dot_dimension_numbers<[1], [0], [0], [1], [0, 0, 1, 1], [], []>} : vector<16x128xf32>, vector<128x128xf32>, vector<16x128xf32> -> vector<16x128xf32>
      %c0_18 = arith.constant 0 : index
      %c0_19 = arith.constant 0 : index
      %23 = vector.load %arg4[%c0_18, %c0_19] : memref<1x128xf32, #tpu.memory_space<vmem>>, vector<1x128xf32>
      %24 = vector.broadcast %23 : vector<1x128xf32> to vector<16x128xf32>
      %25 = arith.addf %22, %24 : vector<16x128xf32>
      %cst_20 = arith.constant 0.000000e+00 : f32
      %26 = vector.broadcast %cst_20 : f32 to vector<16x128xf32>
      %27 = arith.maximumf %25, %26 : vector<16x128xf32>
      %c0_21 = arith.constant 0 : index
      %c0_22 = arith.constant 0 : index
      %28 = vector.load %arg5[%c0_21, %c0_22] : memref<128x128xf32, #tpu.memory_space<vmem>>, vector<128x128xf32>
      %cst_23 = arith.constant dense<0.000000e+00> : vector<16x128xf32>
      %29 = tpu.matmul %27, %28, %cst_23 {dimension_numbers = #tpu.dot_dimension_numbers<[1], [0], [0], [1], [0, 0, 1, 1], [], []>} : vector<16x128xf32>, vector<128x128xf32>, vector<16x128xf32> -> vector<16x128xf32>
      %c0_24 = arith.constant 0 : index
      %c0_25 = arith.constant 0 : index
      %30 = vector.load %arg6[%c0_24, %c0_25] : memref<1x128xf32, #tpu.memory_space<vmem>>, vector<1x128xf32>
      %31 = vector.broadcast %30 : vector<1x128xf32> to vector<16x128xf32>
      %32 = arith.addf %29, %31 : vector<16x128xf32>
      %cst_26 = arith.constant 0.000000e+00 : f32
      %33 = vector.broadcast %cst_26 : f32 to vector<16x128xf32>
      %34 = arith.maximumf %32, %33 : vector<16x128xf32>
      %c0_27 = arith.constant 0 : index
      %c0_28 = arith.constant 0 : index
      %35 = vector.load %arg11[%c0_27, %c0_28] : memref<16x128xf32, #tpu.memory_space<vmem>>, vector<16x128xf32>
      tpu.vector_store %arg11[%c0_27, %c0_28], %34 {strides = array<i32>} : memref<16x128xf32, #tpu.memory_space<vmem>>, vector<16x128xf32>,
    } else {
    }
    %c0 = arith.constant 0 : index
    %c0_1 = arith.constant 0 : index
    %3 = vector.load %arg11[%c0, %c0_1] : memref<16x128xf32, #tpu.memory_space<vmem>>, vector<16x128xf32>
    %c0_2 = arith.constant 0 : index
    %c0_3 = arith.constant 0 : index
    %4 = vector.load %arg7[%c0_2, %c0_3] : memref<128x128xf32, #tpu.memory_space<vmem>>, vector<128x128xf32>
    %cst = arith.constant dense<0.000000e+00> : vector<16x128xf32>
    %5 = tpu.matmul %3, %4, %cst {dimension_numbers = #tpu.dot_dimension_numbers<[1], [0], [0], [1], [0, 0, 1, 1], [], []>} : vector<16x128xf32>, vector<128x128xf32>, vector<16x128xf32> -> vector<16x128xf32>
    %c0_4 = arith.constant 0 : index
    %c0_5 = arith.constant 0 : index
    %6 = vector.load %arg8[%c0_4, %c0_5] : memref<1x128xf32, #tpu.memory_space<vmem>>, vector<1x128xf32>
    %7 = vector.broadcast %6 : vector<1x128xf32> to vector<16x128xf32>
    %8 = arith.addf %5, %7 : vector<16x128xf32>
    %c0_6 = arith.constant 0 : index
    %c0_7 = arith.constant 0 : index
    %9 = vector.load %arg10[%c0_6, %c0_7] : memref<16x128xf32, #tpu.memory_space<vmem>>, vector<16x128xf32>
    tpu.vector_store %arg10[%c0_6, %c0_7], %8 {strides = array<i32>} : memref<16x128xf32, #tpu.memory_space<vmem>>, vector<16x128xf32>,
    %cst_8 = arith.constant 2.000000e+01 : f32
    %10 = vector.broadcast %cst_8 : f32 to vector<16x128xf32>
    %11 = arith.cmpf ogt, %8, %10 : vector<16x128xf32>
    %cst_9 = arith.constant 2.000000e+01 : f32
    %12 = vector.broadcast %cst_9 : f32 to vector<16x128xf32>
    %13 = arith.minimumf %8, %12 : vector<16x128xf32>
    %14 = math.exp %13 : vector<16x128xf32>
    %15 = math.log1p %14 : vector<16x128xf32>
    %16 = arith.select %11, %8, %15 : vector<16x128xi1>, vector<16x128xf32>
    %cst_10 = arith.constant 1.000000e-07 : f32
    %17 = vector.broadcast %cst_10 : f32 to vector<16x128xf32>
    %18 = arith.addf %16, %17 : vector<16x128xf32>
    %c0_11 = arith.constant 0 : index
    %c0_12 = arith.constant 0 : index
    %19 = vector.load %arg9[%c0_11, %c0_12] : memref<16x128xf32, #tpu.memory_space<vmem>>, vector<16x128xf32>
    tpu.vector_store %arg9[%c0_11, %c0_12], %18 {strides = array<i32>} : memref<16x128xf32, #tpu.memory_space<vmem>>, vector<16x128xf32>,
    return
  }
  func.func @transform_0(%arg0: i32, %arg1: i32) -> (i32, i32) {
    %c0_i32 = arith.constant 0 : i32
    %c0_i32_0 = arith.constant 0 : i32
    return %arg0, %c0_i32 : i32, i32
  }
  func.func @transform_1(%arg0: i32, %arg1: i32) -> (i32, i32) {
    %c0_i32 = arith.constant 0 : i32
    %c0_i32_0 = arith.constant 0 : i32
    %c0_i32_1 = arith.constant 0 : i32
    return %c0_i32, %c0_i32_0 : i32, i32
  }
  func.func @transform_2(%arg0: i32, %arg1: i32) -> (i32, i32) {
    %c0_i32 = arith.constant 0 : i32
    %c0_i32_0 = arith.constant 0 : i32
    %c0_i32_1 = arith.constant 0 : i32
    return %c0_i32, %c0_i32_0 : i32, i32
  }
  func.func @transform_3(%arg0: i32, %arg1: i32) -> (i32, i32) {
    %c0_i32 = arith.constant 0 : i32
    %c0_i32_0 = arith.constant 0 : i32
    %c0_i32_1 = arith.constant 0 : i32
    return %c0_i32, %c0_i32_0 : i32, i32
  }
  func.func @transform_4(%arg0: i32, %arg1: i32) -> (i32, i32) {
    %c0_i32 = arith.constant 0 : i32
    %c0_i32_0 = arith.constant 0 : i32
    %c0_i32_1 = arith.constant 0 : i32
    return %c0_i32, %c0_i32_0 : i32, i32
  }
  func.func @transform_5(%arg0: i32, %arg1: i32) -> (i32, i32) {
    %c0_i32 = arith.constant 0 : i32
    %c0_i32_0 = arith.constant 0 : i32
    return %c0_i32, %arg1 : i32, i32
  }
  func.func @transform_6(%arg0: i32, %arg1: i32) -> (i32, i32) {
    %c0_i32 = arith.constant 0 : i32
    %c0_i32_0 = arith.constant 0 : i32
    return %c0_i32, %arg1 : i32, i32
  }
  func.func @transform_7(%arg0: i32, %arg1: i32) -> (i32, i32) {
    %c0_i32 = arith.constant 0 : i32
    return %arg0, %arg1 : i32, i32
  }
  func.func @transform_8(%arg0: i32, %arg1: i32) -> (i32, i32) {
    %c0_i32 = arith.constant 0 : i32
    return %arg0, %arg1 : i32, i32
  }
}

</mosaic_0001>

<bundles_post_ra>
// kernel: joint_node_decoder_forward.1
= control target key start
LH: loop header
LB: loop body
LE: loop exit
PB: predicated region body
PF: predicated region fallthrough
CT: control target
= control target key end

     0   :  { %s456_s1 = inlined_call_operand.vmem [shape: f32[128,128], index: 1, kind: input, shape index: {}]   ;;  %s457_s3 = inlined_call_operand.vmem [shape: f32[128,128], index: 3, kind: input, shape index: {}]   ;;  %s458_s2 = inlined_call_operand.vmem [shape: f32[1,128], index: 2, kind: input, shape index: {}]   ;;  %s459_s0 = inlined_call_operand.vmem [shape: f32[16,128], index: 0, kind: input, shape index: {}]   ;;  %s460_s4 = inlined_call_operand.vmem [shape: f32[1,128], index: 4, kind: input, shape index: {}]   ;;  %s461_s5 = inlined_call_operand.vmem [shape: f32[128,128], index: 5, kind: input, shape index: {}]   ;;  %s462_s6 = inlined_call_operand.vmem [shape: f32[1,128], index: 6, kind: input, shape index: {}]   ;;  %s463_s8 = inlined_call_operand.vmem [shape: f32[16,128], index: 8, kind: output, shape index: {1}]   ;;  %s464_s7 = inlined_call_operand.vmem [shape: f32[16,128], index: 7, kind: output, shape index: {0}]  }
   0x1   :  { %v49_v0 = vld [vmem:[%s456_s1 + $0x78] sm:$0xff]  ;;  %v48_v1 = vld [vmem:[%s456_s1 + $0x70] sm:$0xff]  ;;  %v47_v2 = vld [vmem:[%s456_s1 + $0x68] sm:$0xff] }
   0x2   :  { %54 = vmatpush.msra.mxu0 %v49_v0  ;;  %213 = vmatpush.msra.mxu3 %v49_v0  ;;  %v46_v3 = vld [vmem:[%s456_s1 + $0x60] sm:$0xff]  ;;  %v45_v4 = vld [vmem:[%s456_s1 + $0x58] sm:$0xff]  ;;  %v93_v6 = vld [vmem:[%s457_s3 + $0x70] sm:$0xff] }
   0x3   :  { %v94_v5 = vld [vmem:[%s457_s3 + $0x78] sm:$0xff]  ;;  %v44_v7 = vld [vmem:[%s456_s1 + $0x50] sm:$0xff]  ;;  %v92_v8 = vld [vmem:[%s457_s3 + $0x68] sm:$0xff] }
   0x4   :  { %55 = vmatpush.msra.mxu0 %v48_v1  ;;  %214 = vmatpush.msra.mxu3 %v48_v1  ;;  %v43_v9 = vld [vmem:[%s456_s1 + $0x48] sm:$0xff]  ;;  %v91_v10 = vld [vmem:[%s457_s3 + $0x60] sm:$0xff]  ;;  %v90_v12 = vld [vmem:[%s457_s3 + $0x58] sm:$0xff] }
   0x5   :  { %99 = vmatpush.msra.mxu1 %v94_v5  ;;  %v42_v11 = vld [vmem:[%s456_s1 + $0x40] sm:$0xff]  ;;  %v41_v13 = vld [vmem:[%s456_s1 + $0x38] sm:$0xff]  ;;  %v89_v14 = vld [vmem:[%s457_s3 + $0x50] sm:$0xff] }
   0x6   :  { %56 = vmatpush.msra.mxu0 %v47_v2  ;;  %215 = vmatpush.msra.mxu3 %v47_v2  ;;  %v40_v15 = vld [vmem:[%s456_s1 + $0x30] sm:$0xff]  ;;  %v88_v16 = vld [vmem:[%s457_s3 + $0x48] sm:$0xff]  ;;  %v87_v18 = vld [vmem:[%s457_s3 + $0x40] sm:$0xff] }
   0x7   :  { %100 = vmatpush.msra.mxu1 %v93_v6  ;;  %v39_v17 = vld [vmem:[%s456_s1 + $0x28] sm:$0xff]  ;;  %v38_v19 = vld [vmem:[%s456_s1 + $0x20] sm:$0xff]  ;;  %v86_v20 = vld [vmem:[%s457_s3 + $0x38] sm:$0xff] }
   0x8   :  { %57 = vmatpush.msra.mxu0 %v46_v3  ;;  %216 = vmatpush.msra.mxu3 %v46_v3  ;;  %v37_v21 = vld [vmem:[%s456_s1 + $0x18] sm:$0xff]  ;;  %v85_v22 = vld [vmem:[%s457_s3 + $0x30] sm:$0xff]  ;;  %v84_v24 = vld [vmem:[%s457_s3 + $0x28] sm:$0xff] }
   0x9   :  { %101 = vmatpush.msra.mxu1 %v92_v8  ;;  %v36_v23 = vld [vmem:[%s456_s1 + $0x10] sm:$0xff]  ;;  %v35_v25 = vld [vmem:[%s456_s1 + $0x8] sm:$0xff]  ;;  %v83_v26 = vld [vmem:[%s457_s3 + $0x20] sm:$0xff] }
   0xa   :  { %58 = vmatpush.msra.mxu0 %v45_v4  ;;  %217 = vmatpush.msra.mxu3 %v45_v4  ;;  %v34_v27 = vld [vmem:[%s456_s1] sm:$0xff]  ;;  %v33_v29 = vld [vmem:[%s459_s0 + $0x8] sm:$0xff]  ;;  %v82_v30 = vld [vmem:[%s457_s3 + $0x18] sm:$0xff] }
   0xb   :  { %102 = vmatpush.msra.mxu1 %v91_v10  ;;  %v32_v28 = vld [vmem:[%s459_s0] sm:$0xff]  ;;  %v81_v31 = vld [vmem:[%s457_s3 + $0x10] sm:$0xff]  ;;  %v80_v32 = vld [vmem:[%s457_s3 + $0x8] sm:$0xff] }
   0xc   :  { %59 = vmatpush.msra.mxu0 %v44_v7  ;;  %218 = vmatpush.msra.mxu3 %v44_v7  ;;  %v79_v33 = vld [vmem:[%s457_s3] sm:$0xff]  ;;  %v143_v34 = vld [vmem:[%s461_s5 + $0x78] sm:$0xff]  ;;  %v142_v35 = vld [vmem:[%s461_s5 + $0x70] sm:$0xff] }
   0xd   :  { %103 = vmatpush.msra.mxu1 %v90_v12  ;;  %148 = vmatpush.msra.mxu2 %v143_v34  ;;  %v141_v36 = vld [vmem:[%s461_s5 + $0x68] sm:$0xff]  ;;  %v140_v37 = vld [vmem:[%s461_s5 + $0x60] sm:$0xff]  ;;  %v139_v38 = vld [vmem:[%s461_s5 + $0x58] sm:$0xff] }
   0xe   :  { %60 = vmatpush.msra.mxu0 %v43_v9  ;;  %219 = vmatpush.msra.mxu3 %v43_v9  ;;  %v138_v39 = vld [vmem:[%s461_s5 + $0x50] sm:$0xff]  ;;  %v137_v40 = vld [vmem:[%s461_s5 + $0x48] sm:$0xff]  ;;  %v136_v41 = vld [vmem:[%s461_s5 + $0x40] sm:$0xff] }
   0xf   :  { %104 = vmatpush.msra.mxu1 %v89_v14  ;;  %149 = vmatpush.msra.mxu2 %v142_v35  ;;  %v135_v42 = vld [vmem:[%s461_s5 + $0x38] sm:$0xff]  ;;  %v229_v43 = vld [vmem:[%s458_s2] ss:$0 sm:$0xff]  ;;  %v134_v44 = vld [vmem:[%s461_s5 + $0x30] sm:$0xff] }
  0x10   :  { %61 = vmatpush.msra.mxu0 %v42_v11  ;;  %220 = vmatpush.msra.mxu3 %v42_v11  ;;  %v133_v45 = vld [vmem:[%s461_s5 + $0x28] sm:$0xff]  ;;  %v132_v48 = vld [vmem:[%s461_s5 + $0x20] sm:$0xff]  ;;  %v131_v50 = vld [vmem:[%s461_s5 + $0x18] sm:$0xff] }
  0x11   :  { %105 = vmatpush.msra.mxu1 %v88_v16  ;;  %150 = vmatpush.msra.mxu2 %v141_v36  ;;  %v130_v54 = vld [vmem:[%s461_s5 + $0x10] sm:$0xff]  ;;  %v129_v55 = vld [vmem:[%s461_s5 + $0x8] sm:$0xff]  ;;  %v128_v56 = vld [vmem:[%s461_s5] sm:$0xff] }
  0x12   :  { %62 = vmatpush.msra.mxu0 %v41_v13  ;;  %221 = vmatpush.msra.mxu3 %v41_v13  ;;  %v230_v57 = vld [vmem:[%s460_s4] ss:$0 sm:$0xff] }
  0x13   :  { %106 = vmatpush.msra.mxu1 %v87_v18  ;;  %151 = vmatpush.msra.mxu2 %v140_v37  ;;  %v231_v0 = vld [vmem:[%s462_s6] ss:$0 sm:$0xff] }
  0x14   :  { %63 = vmatpush.msra.mxu0 %v40_v15  ;;  %222 = vmatpush.msra.mxu3 %v40_v15 }
  0x15   :  { %107 = vmatpush.msra.mxu1 %v86_v20  ;;  %152 = vmatpush.msra.mxu2 %v139_v38 }
  0x16   :  { %64 = vmatpush.msra.mxu0 %v39_v17  ;;  %223 = vmatpush.msra.mxu3 %v39_v17 }
  0x17   :  { %108 = vmatpush.msra.mxu1 %v85_v22  ;;  %153 = vmatpush.msra.mxu2 %v138_v39 }
  0x18   :  { %65 = vmatpush.msra.mxu0 %v38_v19  ;;  %224 = vmatpush.msra.mxu3 %v38_v19 }
  0x19   :  { %109 = vmatpush.msra.mxu1 %v84_v24  ;;  %154 = vmatpush.msra.mxu2 %v137_v40 }
  0x1a   :  { %66 = vmatpush.msra.mxu0 %v37_v21  ;;  %225 = vmatpush.msra.mxu3 %v37_v21 }
  0x1b   :  { %110 = vmatpush.msra.mxu1 %v83_v26  ;;  %155 = vmatpush.msra.mxu2 %v136_v41 }
  0x1c   :  { %67 = vmatpush.msra.mxu0 %v36_v23  ;;  %226 = vmatpush.msra.mxu3 %v36_v23 }
  0x1d   :  { %111 = vmatpush.msra.mxu1 %v82_v30  ;;  %156 = vmatpush.msra.mxu2 %v135_v42 }
  0x1e   :  { %68 = vmatpush.msra.mxu0 %v35_v25  ;;  %227 = vmatpush.msra.mxu3 %v35_v25 }
  0x1f   :  { %112 = vmatpush.msra.mxu1 %v81_v31  ;;  %157 = vmatpush.msra.mxu2 %v134_v44 }
  0x20   :  { %69 = vmatpush.msra.mxu0 %v34_v27  ;;  %228 = vmatpush.msra.mxu3 %v34_v27 }
  0x21   :  { %70 = vmatmul.f32.vlgmr.msra.gmra.mxu0 %v32_v28  ;;  %73 = vmatmul.f32.vlgmr.msra.gmra.mxu3 %v33_v29 }
  0x22   :  { %113 = vmatpush.msra.mxu1 %v80_v32  ;;  %158 = vmatpush.msra.mxu2 %v133_v45 }
  0x24   :  { %114 = vmatpush.msra.mxu1 %v79_v33  ;;  %159 = vmatpush.msra.mxu2 %v132_v48 }
  0x26   :  { %160 = vmatpush.msra.mxu2 %v131_v50 }
  0x28   :  { %161 = vmatpush.msra.mxu2 %v130_v54 }
  0x2a   :  { %162 = vmatpush.msra.mxu2 %v129_v55 }
  0x2c   :  { %163 = vmatpush.msra.mxu2 %v128_v56 }
  0x9e   :  { %v71_v46 = vpop.f32.mrf.mxu0 }
  0x9f   :  { %v72_v47 = vadd.f32 %v229_v43, %v71_v46 }
  0xa1   :  { %v77_v49 = vmax.f32 %v72_v47, 0.0 }
  0xa3   :  { %115 = vmatmul.f32.vlgmr.msra.gmra.mxu1 %v77_v49 }
  0xa4   :  { %v74_v51 = vpop.f32.mrf.mxu3 }
  0xa5   :  { %v75_v52 = vadd.f32 %v229_v43, %v74_v51 }
  0xa7   :  { %v78_v53 = vmax.f32 %v75_v52, 0.0 }
  0xab   :  { %118 = vmatmul.f32.gmra.mxu1 %v78_v53 }
 0x120   :  { %v116_v58 = vpop.f32.mrf.mxu1 }
 0x121   :  { %v117_v59 = vadd.f32 %v230_v57, %v116_v58 }
 0x123   :  { %v122_v60 = vmax.f32 %v117_v59, 0.0 }
 0x125   :  { %164 = vmatmul.f32.vlgmr.msra.gmra.mxu2 %v122_v60 }
 0x128   :  { %v119_v61 = vpop.f32.mrf.mxu1 }
 0x129   :  { %v120_v62 = vadd.f32 %v230_v57, %v119_v61 }
 0x12b   :  { %v123_v63 = vmax.f32 %v120_v62, 0.0 }
 0x12d   :  { %167 = vmatmul.f32.gmra.mxu2 %v123_v63 }
 0x1a8   :  { %v165_v1 = vpop.f32.mrf.mxu2 }
 0x1a9   :  { %v166_v2 = vadd.f32 %v231_v0, %v165_v1 }
 0x1ab   :  { %171 = vst [vmem:[%s463_s8] sm:$0xff] %v166_v2  ;;  %v175_v3 = vmin.f32 %v166_v2, 20.0  ;;  %vm173_vm1 = vcmp.gt.f32.partialorder %v166_v2, 20.0 }
 0x1ad   :  { %v177_v4 = vmul.f32 1.442695, %v175_v3 }
 0x1af   :  { %232 = vpow2.f32 %v177_v4 }
 0x1b0   :  { %v168_v5 = vpop.f32.mrf.mxu2 }
 0x1b1   :  { %v169_v6 = vadd.f32 %v231_v0, %v168_v5 }
 0x1b3   :  { %172 = vst [vmem:[%s463_s8 + $0x8] sm:$0xff] %v169_v6  ;;  %v176_v7 = vmin.f32 %v169_v6, 20.0  ;;  %vm174_vm3 = vcmp.gt.f32.partialorder %v169_v6, 20.0 }
 0x1b5   :  { %v233_v8 = vpop.eup %232  ;;  %v179_v9 = vmul.f32 1.442695, %v176_v7 }
 0x1b6   :  { %v181_v10 = vadd.f32 1.0, %v233_v8  ;;  %v184_v11 = vmul.f32 -0.5, %v233_v8  ;;  %v187_v13 = vand.u32 2147483647, %v233_v8 }
 0x1b7   :  { %234 = vpow2.f32 %v179_v9 }
 0x1b8   :  { %236 = vlog2.f32 %v181_v10  ;;  %v185_v12 = vadd.f32 1.0, %v184_v11  ;;  %vm188_vm0 = vcmp.lt.f32.partialorder %v187_v13, 0.0004427343 }
 0x1ba   :  { %v186_v18 = vmul.f32 %v233_v8, %v185_v12 }
 0x1bd   :  { %v235_v14 = vpop.eup %234 }
 0x1be   :  { %v237_v15 = vpop.eup %236  ;;  %v190_v16 = vadd.f32 1.0, %v235_v14  ;;  %v193_v19 = vmul.f32 -0.5, %v235_v14  ;;  %v196_v24 = vand.u32 2147483647, %v235_v14 }
 0x1bf   :  { %v183_v17 = vmul.f32 0.6931472, %v237_v15 }
 0x1c0   :  { %238 = vlog2.f32 %v190_v16  ;;  %v194_v23 = vadd.f32 1.0, %v193_v19  ;;  %vm197_vm2 = vcmp.lt.f32.partialorder %v196_v24, 0.0004427343 }
 0x1c1   :  { %v189_v20 = vsel %vm188_vm0, %v186_v18, %v183_v17 }
 0x1c2   :  { %v199_v21 = vsel %vm173_vm1, %v166_v2, %v189_v20  ;;  %v195_v27 = vmul.f32 %v235_v14, %v194_v23 }
 0x1c3   :  { %v201_v22 = vadd.f32 1e-07, %v199_v21 }
 0x1c5   :  { %203 = vst [vmem:[%s464_s7] sm:$0xff] %v201_v22 }
 0x1c6   :  { %v239_v25 = vpop.eup %238 }
 0x1c7   :  { %v192_v26 = vmul.f32 0.6931472, %v239_v25 }
 0x1c9   :  { %v198_v28 = vsel %vm197_vm2, %v195_v27, %v192_v26 }
 0x1ca   :  { %v200_v29 = vsel %vm174_vm3, %v169_v6, %v198_v28 }
 0x1cb   :  { %v202_v30 = vadd.f32 1e-07, %v200_v29 }
 0x1cd   :  { %204 = vst [vmem:[%s464_s7 + $0x8] sm:$0xff] %v202_v30 }

</bundles_post_ra>
